<compile_context>
chip_gen: v7x
topology: tpu7x:2x2x1
jax: 0.10.0
libtpu: 0.0.40
codegen_flags: <defaults>
</compile_context>

<pallas_src>
import jax
import jax.numpy as jnp
from jax import lax
from jax.experimental import pallas as pl
from jax.experimental.pallas import tpu as pltpu

GROUPS_NUM = 10
LEN_STATE = 6 * GROUPS_NUM   # 60
HIDDEN = 256
_W2_PAD_ROWS = 8             # pad the w2 row-vector to a full sublane group


def _round_up(n, m):
    return ((n + m - 1) // m) * m


def critic_kernel(x_ref, w1_ref, b1_ref, w2p_ref, b2_ref, v_ref):
    """One batch tile:  v_row = relu(x @ W1 + b1) @ w2 + b2.

    x_ref  : (TB, 60)    VMEM  (f32 or bf16 storage)
    w1_ref : (60, 256)   VMEM  (f32 or bf16 storage; resident across steps)
    b1_ref : (1, 256)    VMEM  f32
    w2p_ref: (8, 256)    VMEM  f32; row 0 = w2^T, rows 1..7 are zero padding
    b2_ref : (1, 1)      SMEM  f32 scalar
    v_ref  : (1, 1, TB)  VMEM  f32  -- lane-dense: batch on the lane axis
    """
    # Layer 1 on the MXU, f32 accumulation (bf16 inputs go to the MXU as bf16).
    h = jnp.dot(x_ref[...], w1_ref[...], preferred_element_type=jnp.float32)
    h = jnp.maximum(h + b1_ref[...], 0.0)                       # (TB, 256) VPU ReLU

    # Layer 2: contract the hidden axis against w2 with an (8,256)x(TB,256)^T
    # dot_general.  Row 0 of the (8, TB) result is the real output and is
    # already lane-dense, so the store below is an unmasked contiguous vst.
    s = lax.dot_general(
        w2p_ref[...], h,
        dimension_numbers=(((1,), (1,)), ((), ())),
        preferred_element_type=jnp.float32)                     # (8, TB)
    row = s[0:1, :] + b2_ref[0, 0]                              # (1, TB)
    v_ref[0] = row.astype(v_ref.dtype)


def critic_forward(x, w1, b1, w2, b2, *, tb=512):
    """x: (B, 60) -> (B,) f32  (scalar if B == 1, matching torch .squeeze()).

    x / w1 may be f32 or bf16 (bf16 halves HBM read traffic; accumulation is
    always f32).  b1 / w2 / b2 are kept in f32 inside the kernel.
    """
    B, feat = x.shape
    assert feat == LEN_STATE, f"expected {LEN_STATE} features, got {feat}"

    itemsize = jnp.dtype(x.dtype).itemsize
    row_align = 8 if itemsize >= 4 else 16        # sublane packing for bf16
    TB = _round_up(min(tb, B), row_align)          # batch tile (rows per step)
    num_tiles = pl.cdiv(B, TB)
    Bp = num_tiles * TB
    if Bp != B:                                    # pad tail tile, sliced below
        x = jnp.pad(x, ((0, Bp - B), (0, 0)))

    b1_2d = b1.reshape(1, HIDDEN).astype(jnp.float32)
    # (256,1) -> (1,256) row, padded with zero rows to a full sublane group.
    w2p = jnp.pad(w2.reshape(1, HIDDEN).astype(jnp.float32),
                  ((0, _W2_PAD_ROWS - 1), (0, 0)))
    b2_2d = b2.reshape(1, 1).astype(jnp.float32)

    flops = 2 * Bp * LEN_STATE * HIDDEN + 2 * Bp * HIDDEN
    bytes_accessed = (
        x.size * itemsize
        + w1.size * jnp.dtype(w1.dtype).itemsize
        + b1_2d.size * 4 + w2p.size * 4 + 4
        + num_tiles * TB * 4)

    out = pl.pallas_call(
        critic_kernel,
        out_shape=jax.ShapeDtypeStruct((num_tiles, 1, TB), jnp.float32),
        grid=(num_tiles,),
        in_specs=[
            pl.BlockSpec((TB, LEN_STATE), lambda i: (i, 0)),        # x: tiled
            pl.BlockSpec((LEN_STATE, HIDDEN), lambda i: (0, 0)),    # W1: resident
            pl.BlockSpec((1, HIDDEN), lambda i: (0, 0)),            # b1: resident
            pl.BlockSpec((_W2_PAD_ROWS, HIDDEN), lambda i: (0, 0)),  # w2: resident
            pl.BlockSpec(memory_space=pltpu.MemorySpace.SMEM),      # b2: scalar
        ],
        out_specs=pl.BlockSpec((1, 1, TB), lambda i: (i, 0, 0)),    # lane-dense
        compiler_params=pltpu.CompilerParams(
            dimension_semantics=("parallel",)),                     # megacore on v7x
        cost_estimate=pl.CostEstimate(
            flops=flops, transcendentals=0, bytes_accessed=bytes_accessed),
    )(x, w1, b1_2d, w2p, b2_2d)

    v = out.reshape(-1)[:B]
    return jnp.squeeze(v)


def init_params(key):
    """Deterministic init mimicking nn.Linear's U(-1/sqrt(fan_in), 1/sqrt(fan_in))."""
    k1, k2, k3, k4 = jax.random.split(key, 4)
    bound1 = 1.0 / jnp.sqrt(jnp.float32(LEN_STATE))
    bound2 = 1.0 / jnp.sqrt(jnp.float32(HIDDEN))
    w1 = jax.random.uniform(k1, (LEN_STATE, HIDDEN), jnp.float32, -bound1, bound1)
    b1 = jax.random.uniform(k2, (HIDDEN,), jnp.float32, -bound1, bound1)
    w2 = jax.random.uniform(k3, (HIDDEN, 1), jnp.float32, -bound2, bound2)
    b2 = jax.random.uniform(k4, (1,), jnp.float32, -bound2, bound2)
    return w1, b1, w2, b2


if __name__ == "__main__":
    key = jax.random.PRNGKey(0)
    k_x, k_p = jax.random.split(key)
    w1, b1, w2, b2 = init_params(k_p)

    def reference(xv):
        h = jnp.maximum(jnp.dot(xv.astype(jnp.float32), w1,
                                precision="highest") + b1, 0.0)
        return jnp.squeeze(jnp.dot(h, w2, precision="highest") + b2)

    # Small-batch f32 path (single tile, tail padded to the sublane multiple).
    x_small = jax.random.normal(k_x, (4, LEN_STATE), jnp.float32)
    v = jax.block_until_ready(critic_forward(x_small, w1, b1, w2, b2))
    assert v.shape == (4,)
    assert jnp.allclose(v, reference(x_small), atol=1e-4, rtol=1e-4)

    # Multi-tile f32 path (exercises the batch grid, parallel axis, tail pad).
    x_big = jax.random.normal(k_x, (520, LEN_STATE), jnp.float32)
    v_big = jax.block_until_ready(critic_forward(x_big, w1, b1, w2, b2))
    assert v_big.shape == (520,)
    assert jnp.allclose(v_big, reference(x_big), atol=1e-4, rtol=1e-4)

    # bf16 storage for x / W1 (halved HBM read traffic), f32 accumulation.
    v_bf16 = jax.block_until_ready(
        critic_forward(x_small.astype(jnp.bfloat16),
                       w1.astype(jnp.bfloat16), b1, w2, b2))
    assert v_bf16.shape == (4,)
    assert jnp.allclose(v_bf16, reference(x_small), atol=5e-2, rtol=5e-2)

    print("KERNEL_OK")
</pallas_src>

<mosaic_0001>
module attributes {stable_mosaic.version = 11 : i64} {
  func.func @critic_kernel(%arg0: i32, %arg1: memref<8x60xf32, #tpu.memory_space<vmem>>, %arg2: memref<60x256xf32, #tpu.memory_space<vmem>>, %arg3: memref<1x256xf32, #tpu.memory_space<vmem>>, %arg4: memref<8x256xf32, #tpu.memory_space<vmem>>, %arg5: memref<1x1xf32, #tpu.memory_space<smem>>, %arg6: memref<1x1x8xf32, #tpu.memory_space<vmem>>) attributes {dimension_semantics = [#tpu.dimension_semantics<parallel>], iteration_bounds = array<i64: 1>, scalar_prefetch = 0 : i64, scratch_operands = 0 : i64, tpu.core_type = #tpu.core_type<tc>, window_params = [{transform_indices = @transform_0, window_bounds = array<i64: 8, 60>}, {pipeline_mode = #tpu.pipeline_mode<synchronous>, transform_indices = @transform_1, window_bounds = array<i64: 60, 256>}, {pipeline_mode = #tpu.pipeline_mode<synchronous>, transform_indices = @transform_2, window_bounds = array<i64: 1, 256>}, {pipeline_mode = #tpu.pipeline_mode<synchronous>, transform_indices = @transform_3, window_bounds = array<i64: 8, 256>}, {transform_indices = @transform_4, window_bounds = array<i64: 1, 1>}, {transform_indices = @transform_5, window_bounds = array<i64: 1, 1, 8>}]} {
    %c0 = arith.constant 0 : index
    %c0_0 = arith.constant 0 : index
    %0 = vector.load %arg1[%c0, %c0_0] : memref<8x60xf32, #tpu.memory_space<vmem>>, vector<8x60xf32>
    %c0_1 = arith.constant 0 : index
    %c0_2 = arith.constant 0 : index
    %1 = vector.load %arg2[%c0_1, %c0_2] : memref<60x256xf32, #tpu.memory_space<vmem>>, vector<60x256xf32>
    %cst = arith.constant dense<0.000000e+00> : vector<8x256xf32>
    %2 = tpu.matmul %0, %1, %cst {dimension_numbers = #tpu.dot_dimension_numbers<[1], [0], [0], [1], [0, 0, 1, 1], [], []>} : vector<8x60xf32>, vector<60x256xf32>, vector<8x256xf32> -> vector<8x256xf32>
    %c0_3 = arith.constant 0 : index
    %c0_4 = arith.constant 0 : index
    %3 = vector.load %arg3[%c0_3, %c0_4] : memref<1x256xf32, #tpu.memory_space<vmem>>, vector<1x256xf32>
    %4 = vector.broadcast %3 : vector<1x256xf32> to vector<8x256xf32>
    %5 = arith.addf %2, %4 : vector<8x256xf32>
    %cst_5 = arith.constant 0.000000e+00 : f32
    %6 = vector.broadcast %cst_5 : f32 to vector<8x256xf32>
    %7 = arith.maximumf %5, %6 : vector<8x256xf32>
    %c0_6 = arith.constant 0 : index
    %c0_7 = arith.constant 0 : index
    %8 = vector.load %arg4[%c0_6, %c0_7] : memref<8x256xf32, #tpu.memory_space<vmem>>, vector<8x256xf32>
    %cst_8 = arith.constant dense<0.000000e+00> : vector<8x8xf32>
    %9 = tpu.matmul %8, %7, %cst_8 {dimension_numbers = #tpu.dot_dimension_numbers<[1], [1], [0], [0], [0, 0, 1, 0], [], []>} : vector<8x256xf32>, vector<8x256xf32>, vector<8x8xf32> -> vector<8x8xf32>
    %10 = vector.extract_strided_slice %9 {offsets = [0, 0], sizes = [1, 8], strides = [1, 1]} : vector<8x8xf32> to vector<1x8xf32>
    %c0_9 = arith.constant 0 : index
    %c0_10 = arith.constant 0 : index
    %11 = memref.load %arg5[%c0_9, %c0_10] : memref<1x1xf32, #tpu.memory_space<smem>>
    %12 = vector.broadcast %11 : f32 to vector<1x8xf32>
    %13 = arith.addf %10, %12 : vector<1x8xf32>
    %c0_11 = arith.constant 0 : index
    %c0_12 = arith.constant 0 : index
    %c0_13 = arith.constant 0 : index
    %14 = vector.load %arg6[%c0_11, %c0_12, %c0_13] : memref<1x1x8xf32, #tpu.memory_space<vmem>>, vector<1x1x8xf32>
    %15 = vector.shape_cast %14 : vector<1x1x8xf32> to vector<1x8xf32>
    %16 = vector.shape_cast %13 : vector<1x8xf32> to vector<1x1x8xf32>
    tpu.vector_store %arg6[%c0_11, %c0_12, %c0_13], %16 {strides = array<i32>} : memref<1x1x8xf32, #tpu.memory_space<vmem>>, vector<1x1x8xf32>,
    return
  }
  func.func @transform_0(%arg0: i32) -> (i32, i32) {
    %c0_i32 = arith.constant 0 : i32
    %c0_i32_0 = arith.constant 0 : i32
    return %arg0, %c0_i32 : i32, i32
  }
  func.func @transform_1(%arg0: i32) -> (i32, i32) {
    %c0_i32 = arith.constant 0 : i32
    %c0_i32_0 = arith.constant 0 : i32
    %c0_i32_1 = arith.constant 0 : i32
    return %c0_i32, %c0_i32_0 : i32, i32
  }
  func.func @transform_2(%arg0: i32) -> (i32, i32) {
    %c0_i32 = arith.constant 0 : i32
    %c0_i32_0 = arith.constant 0 : i32
    %c0_i32_1 = arith.constant 0 : i32
    return %c0_i32, %c0_i32_0 : i32, i32
  }
  func.func @transform_3(%arg0: i32) -> (i32, i32) {
    %c0_i32 = arith.constant 0 : i32
    %c0_i32_0 = arith.constant 0 : i32
    %c0_i32_1 = arith.constant 0 : i32
    return %c0_i32, %c0_i32_0 : i32, i32
  }
  func.func @transform_4(%arg0: i32) -> (i32, i32) {
    %c0_i32 = arith.constant 0 : i32
    %c0_i32_0 = arith.constant 0 : i32
    %c0_i32_1 = arith.constant 0 : i32
    return %c0_i32, %c0_i32_0 : i32, i32
  }
  func.func @transform_5(%arg0: i32) -> (i32, i32, i32) {
    %c0_i32 = arith.constant 0 : i32
    %c0_i32_0 = arith.constant 0 : i32
    %c0_i32_1 = arith.constant 0 : i32
    return %arg0, %c0_i32, %c0_i32_0 : i32, i32, i32
  }
}

</mosaic_0001>

<bundles_post_ra>
// kernel: tpu_custom_call.1
= control target key start
LH: loop header
LB: loop body
LE: loop exit
PB: predicated region body
PF: predicated region fallthrough
CT: control target
= control target key end

     0   :  { %11 = vsyncpa [#allocation4], 0  ;;  %s480_s0 = inlined_call_operand.hbm [shape: f32[8,60], index: 0, kind: input, shape index: {}]   ;;  %s481_s1 = inlined_call_operand.hbm [shape: f32[60,256], index: 1, kind: input, shape index: {}]   ;;  %s482_s2 = inlined_call_operand.vmem [shape: f32[1,256], index: 2, kind: input, shape index: {}]   ;;  %s483_s3 = inlined_call_operand.hbm [shape: f32[8,256], index: 3, kind: input, shape index: {}]   ;;  %s484_s4 = inlined_call_operand.<no memory space> [shape: f32[1,1], index: 4, kind: input, shape index: {}]   ;;  %s485_s5 = inlined_call_operand.hbm [shape: f32[1,1,8], index: 5, kind: output, shape index: {}]  }
   0x1   :  { %12 = vsyncpa [#allocation7], 0 }
   0x2   :  { %13 = vsyncpa [#allocation5], 0  ;;  %s388_s18 = smov [#allocation6]   ;;  %s294_s22 = scalar_lea.hbm %s481_s1, 2048 }
   0x3   :  { %s29_s19 = sshll.u32 %s388_s18, 4  ;;  %p295_p0 = scmp.ne.s32.totalorder %s481_s1, %s294_s22  ;;  %s30_s19 = int_to_ptr.vmem [resolvable:$true] %s29_s19 }
   0x4   :  { %p298_p1 = scmp.lt.u32.totalorder %s294_s22, %s481_s1 }
   0x6   :  { %p300_p2 = pnand %p298_p1, %p295_p0 }
   0x8   :  { %303 = shalt.err (!%p300_p2)
}
   0x9   :  { %s304_s27 = scalar_lea.vmem %s30_s19, 2048  ;;  %p309_p4 = scmp.lt.s32.totalorder %s30_s19, %s30_s19 }
   0xa   :  { %p305_p3 = scmp.ne.s32.totalorder %s30_s19, %s304_s27  ;;  %p310_p5 = scmp.lt.s32.totalorder %s304_s27, %s304_s27 }
   0xc   :  { %p311_p6 = por %p310_p5, %p309_p4 }
   0xe   :  { %p312_p7 = pnand %p311_p6, %p305_p3 }
  0x10   :  { %315 = shalt.err (!%p312_p7)
}
  0x11   :  { %s389_s28 = smov 256   ;;  %s390_s29 = smov 16  }
  0x12   :  { %35 = dma.hbm_to_vmem [thread:$0]  %s481_s1, 2048, %s30_s19, [#allocation7], %s389_s28, %s389_s28, %s390_s29  }
  0x13   :  { %s391_s7 = smov [#allocation3]   ;;  %s392_s9 = smov [#allocation8]  }
  0x14   :  { %s20_s8 = sshll.u32 %s391_s7, 4  ;;  %s44_s10 = sshll.u32 %s392_s9, 4  ;;  %s21_s8 = int_to_ptr.vmem [resolvable:$true] %s20_s8  ;;  %s45_s10 = int_to_ptr.vmem [resolvable:$true] %s44_s10 }
  0x15   :  { %s316_s13 = scalar_lea.hbm %s480_s0, 128 }
  0x16   :  { %p317_p8 = scmp.ne.s32.totalorder %s480_s0, %s316_s13  ;;  %p320_p9 = scmp.lt.u32.totalorder %s316_s13, %s480_s0 }
  0x18   :  { %p322_p10 = pnand %p320_p9, %p317_p8 }
  0x1a   :  { %325 = shalt.err (!%p322_p10)
}
  0x1b   :  { %s326_s1 = scalar_lea.vmem %s21_s8, 128  ;;  %p331_p12 = scmp.lt.s32.totalorder %s21_s8, %s21_s8 }
  0x1c   :  { %p327_p11 = scmp.ne.s32.totalorder %s21_s8, %s326_s1  ;;  %p332_p13 = scmp.lt.s32.totalorder %s326_s1, %s326_s1 }
  0x1e   :  { %p333_p0 = por %p332_p13, %p331_p12 }
  0x20   :  { %p334_p1 = pnand %p333_p0, %p327_p11 }
  0x22   :  { %337 = shalt.err (!%p334_p1)
}
  0x23   :  { %23 = dma.hbm_to_vmem [thread:$0]  %s480_s0, 128, %s21_s8, [#allocation4]  }
  0x24   :  { %s338_s22 = scalar_lea.hbm %s483_s3, 256 }
  0x25   :  { %p339_p2 = scmp.ne.s32.totalorder %s483_s3, %s338_s22  ;;  %p342_p3 = scmp.lt.u32.totalorder %s338_s22, %s483_s3 }
  0x27   :  { %p344_p4 = pnand %p342_p3, %p339_p2 }
  0x29   :  { %347 = shalt.err (!%p344_p4)
}
  0x2a   :  { %s348_s27 = scalar_lea.vmem %s45_s10, 256  ;;  %p353_p6 = scmp.lt.s32.totalorder %s45_s10, %s45_s10 }
  0x2b   :  { %p349_p5 = scmp.ne.s32.totalorder %s45_s10, %s348_s27  ;;  %p354_p7 = scmp.lt.s32.totalorder %s348_s27, %s348_s27 }
  0x2d   :  { %p355_p8 = por %p354_p7, %p353_p6 }
  0x2f   :  { %p356_p9 = pnand %p355_p8, %p349_p5 }
  0x31   :  { %359 = shalt.err (!%p356_p9)
}
  0x32   :  { %47 = dma.hbm_to_vmem [thread:$0]  %s483_s3, 256, %s45_s10, [#allocation7]  }
  0x33   :  { %382 = dma.done.wait [#allocation4], 128  }
  0x34   :  { %383 = vsyncadd [#allocation4], 4294967168 }
  0x35   :  { %384 = dma.done.wait [#allocation7], 2304  }
  0x36   :  { %385 = vsyncadd [#allocation7], 4294964992  ;;  %v393_v0 = vmov 0.0   ;;  %v61_v1 = vld [vmem:[#allocation6 + $0x8] sm:$0xff]  ;;  %v63_v2 = vld [vmem:[#allocation6 + $0x18] sm:$0xff]  ;;  %vm92_vm0 = vcmask 1043456   ;;  %v78_v27 = vlaneseq  ;;  %v245_v41 = vstv %s484_s4 }
  0x37   :  { %163 = vmatprep.mubr.f32.mxu0 %v393_v0  ;;  %v60_v3 = vld [vmem:[#allocation6] sm:$0xff]  ;;  %v268_v4 = vpack.c.bf16 %v63_v2, %v61_v1  ;;  %v62_v5 = vld [vmem:[#allocation6 + $0x10] sm:$0xff]  ;;  %v65_v6 = vld [vmem:[#allocation6 + $0x28] sm:$0xff]  ;;  %vm394_vm1 = vmmov 1   ;;  %vm88_vm3 = vcmask 490496   ;;  %s395_s7 = smov [#allocation9]  }
  0x38   :  { %v67_v7 = vld [vmem:[#allocation6 + $0x38] sm:$0xff]  ;;  %v270_v8 = vpack.c.bf16 %v62_v5, %v60_v3  ;;  %v64_v10 = vld [vmem:[#allocation6 + $0x20] sm:$0xff]  ;;  %v66_v11 = vld [vmem:[#allocation6 + $0x30] sm:$0xff]  ;;  %v79_v28 = vshrl.u32 %v78_v27, 7  ;;  %s255_s8 = sshll.u32 %s395_s7, 4  ;;  %vm247_vm4 = vcmask 57344   ;;  %s256_s8 = int_to_ptr.vmem [resolvable:$true] %s255_s8 }
  0x39   :  { %v272_v9 = vpack.c.bf16 %v67_v7, %v65_v6  ;;  %v69_v12 = vld [vmem:[#allocation6 + $0x48] sm:$0xff]  ;;  %269 = vmatprep.subr.bf16.mxu0 %v268_v4  ;;  %v71_v13 = vld [vmem:[#allocation6 + $0x58] sm:$0xff]  ;;  %v274_v14 = vpack.c.bf16 %v66_v11, %v64_v10  ;;  %v68_v16 = vld [vmem:[#allocation6 + $0x40] sm:$0xff]  ;;  %s364_s9 = scalar_lea.vmem %s256_s8, 32  ;;  %p365_p11 = scmp.lt.s32.totalorder %s256_s8, %s256_s8 }
  0x3a   :  { %271 = vmatpush1.bf16.msra.mxu0 %v270_v8  ;;  %v276_v15 = vpack.c.bf16 %v71_v13, %v69_v12  ;;  %v70_v17 = vld [vmem:[#allocation6 + $0x50] sm:$0xff]  ;;  %v73_v18 = vld [vmem:[#allocation6 + $0x68] sm:$0xff]  ;;  %v75_v19 = vld [vmem:[#allocation6 + $0x78] sm:$0xf]  ;;  %v80_v29 = vsub.s32 0, %v79_v28  ;;  %v84_v31 = vsub.s32 1, %v79_v28 }
  0x3b   :  { %273 = vmatprep.subr.bf16.mxu0 %v272_v9  ;;  %v278_v20 = vpack.c.bf16 %v70_v17, %v68_v16  ;;  %v280_v21 = vpack.c.bf16 %v75_v19, %v73_v18  ;;  %v72_v22 = vld [vmem:[#allocation6 + $0x60] sm:$0xff]  ;;  %v74_v23 = vld [vmem:[#allocation6 + $0x70] sm:$0xf]  ;;  %vm281_vm2 = vmpackc.low %vm92_vm0, %vm394_vm1 }
  0x3c   :  { %v283_v24 = vpack.c.bf16 %v74_v23, %v72_v22  ;;  %v59_v25 = vld [vmem:[#allocation3] sm:$0xff]  ;;  %v173_v26 = vld [vmem:[#allocation8 + $0x8] sm:$0xff]  ;;  %v172_v40 = vld [vmem:[#allocation8] sm:$0xff] }
  0x3d   :  { %238 = vmatprep.mubr.f32.mxu1 %v173_v26  ;;  %v76_v30 = vld [vmem:[%s482_s2] sm:$0x3]  ;;  %s360_s2 = scalar_lea.vmem %s256_s8, 16 }
  0x3e   :  { %275 = vmatpush1.bf16.msra.mxu0 %v274_v14  ;;  %v81_v32 = vrot.slane %v76_v30, %v80_v29  ;;  %v85_v33 = vrot.slane %v76_v30, %v84_v31  ;;  %p361_p10 = scmp.ne.s32.totalorder %s256_s8, %s360_s2  ;;  %p366_p12 = scmp.lt.s32.totalorder %s364_s9, %s360_s2 }
  0x3f   :  { %277 = vmatprep.subr.bf16.mxu0 %v276_v15 }
  0x40   :  { %p367_p13 = por %p366_p12, %p365_p11 }
  0x42   :  { %279 = vmatpush1.bf16.msra.mxu0 %v278_v20  ;;  %p368_p0 = pnand %p367_p13, %p361_p10 }
  0x43   :  { %282 = vmatprep.subr.msk.bf16.mxu0 %vm281_vm2, %v280_v21 }
  0x46   :  { %285 = vmatpush1.bf16.msk.msra.mxu0 %vm281_vm2, %v283_v24 }
  0x49   :  { %267 = vmatmul.mubr.msk.f32.vlgmr.msra.gmra.mrb[0].mxu0 %vm88_vm3, %v59_v25 }
 0x11c   :  { %v165_v34 = vpop.f32.mrb[0].mxu0 }
 0x11d   :  { %v166_v35 = vadd.f32 %v165_v34, %v81_v32  ;;  %v167_v36 = vpop.f32.mrb[1].mxu0 }
 0x11e   :  { %v168_v37 = vadd.f32 %v167_v36, %v85_v33 }
 0x11f   :  { %v170_v39 = vmax.f32 %v166_v35, 0.0 }
 0x120   :  { %v171_v38 = vmax.f32 %v168_v37, 0.0 }
 0x122   :  { %174 = vmatprep.subr.mxu1 %v171_v38 }
 0x123   :  { %175 = vmatpush1.xpose.msra.mxu1 %v170_v39 }
 0x126   :  { %239 = vmatmul.mubr.f32.vlgmr.msra.gmra.mrb[0].mxu1 %v172_v40 }
 0x1f9   :  { %v240_v42 = vpop.f32.mrb[0].mxu1 }
 0x1fa   :  { %v246_v43 = vadd.f32 %v245_v41, %v240_v42  ;;  %v242_v44 = vpop.f32.mrb[1].mxu1 }
 0x1fc   :  { %248 = vst.msk [vmem:[#allocation9] sm:$0x1] %vm247_vm4, %v246_v43 }
 0x1fd   :  { %371 = shalt.err (!%p368_p0)
}
 0x1fe   :  { %s372_s4 = scalar_lea.hbm %s485_s5, 16 }
 0x1ff   :  { %p373_p1 = scmp.ne.s32.totalorder %s485_s5, %s372_s4  ;;  %p376_p2 = scmp.lt.u32.totalorder %s372_s4, %s485_s5 }
 0x201   :  { %p378_p3 = pnand %p376_p2, %p373_p1 }
 0x203   :  { %381 = shalt.err (!%p378_p3)
}
 0x204   :  { %258 = dma.vmem_to_hbm [thread:$0]  %s256_s8, 16, %s485_s5, [#allocation5]  }
 0x205   :  { %386 = dma.done.wait [#allocation5], 16  }
 0x206   :  { %387 = vsyncadd [#allocation5], 4294967280 }
 0x207   :  { %262 = vsyncpa [#allocation4], 1 }
 0x208   :  { %263 = vsyncpa [#allocation7], 1 }
 0x209   :  { %264 = vsyncpa [#allocation5], 1 }

</bundles_post_ra>
